<compile_context>
chip_gen: v5e
topology: v5e:2x2
jax: 0.10.0
libtpu: 0.0.40
codegen_flags: <defaults>
</compile_context>

<pallas_src>
import functools

import jax
import jax.numpy as jnp
import numpy as np
from jax.experimental import pallas as pl
from jax.experimental.pallas import tpu as pltpu

LN_EPS = 1e-5  # torch.nn.LayerNorm default
LANE = 128
SUBLANE_BF16 = 16  # bf16 packs 16 rows per sublane group


def _round_up(x, m):
    return ((x + m - 1) // m) * m


def _layer_norm(v, g, b):
    mu = jnp.mean(v, axis=-1, keepdims=True)
    var = jnp.mean((v - mu) ** 2, axis=-1, keepdims=True)
    return (v - mu) * jax.lax.rsqrt(var + LN_EPS) * g + b


def _pick_batch_blk(batch, target=8):
    """Largest divisor of `batch` <= target that still leaves >= 2 grid steps
    on the batch axis (so v7x's two TensorCores can both be used)."""
    best = 1
    for cand in range(1, min(batch // 2, target) + 1):
        if batch % cand == 0:
            best = cand
    return max(best, 1)


def _pick_head_blk(batch, s_pad, dim):
    """Batch tile for the head kernel: keep the f32 activation tile modest and
    the output block (8,128)-legal (multiple of 8, or the full batch)."""
    for hb in (64, 32, 16, 8):
        if batch % hb == 0 and hb * s_pad * dim * 4 <= (8 << 20):
            return hb
    return batch  # small batches: single full block


def _vmem_limit_bytes(estimate):
    """Re-budget scoped VMEM per TPU generation (v7x only has 64 MiB)."""
    try:
        cap = pltpu.get_tpu_info().vmem_capacity_bytes
    except Exception:
        cap = 64 * 1024 * 1024
    return int(min(max(estimate, 16 * 1024 * 1024), int(cap * 3 / 4)))


# ----------------------------------------------------------------------------
# Pallas kernels
# ----------------------------------------------------------------------------
def embed_kernel(p_ref, w_ref, add_ref, o_ref):
    # p_ref:   (1, S_pad, P)  bf16  (row 0 and trailing pad rows are zero)
    # w_ref:   (P, D)         bf16
    # add_ref: (1, S_pad, D)  f32   (row0 = cls+pos0, rows 1..N = b+pos, rest 0)
    # o_ref:   (1, S_pad, D)  f32
    o_ref[0] = (
        jnp.dot(p_ref[0], w_ref[...], preferred_element_type=jnp.float32)
        + add_ref[0]
    )


def transformer_layers_kernel(
    x_ref, vec_ref, b1_ref, wqkv_ref, wo_ref, w1_ref, w2_ref,
    o_ref, ctx_ref, *, heads, dh, s_valid,
):
    """One (batch-block b, layer d) grid step of the whole transformer stack.

    vec_ref rows: 0 ln1_g, 1 ln1_b, 2 bo, 3 ln2_g, 4 ln2_b, 5 b2 (6,7 zero).
    The softmax scale is already folded into the wq columns of wqkv.
    """
    bf16 = jnp.bfloat16
    b_blk, S, D = o_ref.shape
    inner = heads * dh

    # Residual stream stays resident in VMEM across the depth grid axis.
    @pl.when(pl.program_id(1) == 0)
    def _():
        o_ref[...] = x_ref[...]

    x = o_ref[...]                                       # (b_blk, S, D) f32
    ln1_g, ln1_b = vec_ref[0, 0:1], vec_ref[0, 1:2]      # (1, D)
    bo = vec_ref[0, 2:3]
    ln2_g, ln2_b = vec_ref[0, 3:4], vec_ref[0, 4:5]
    b2 = vec_ref[0, 5:6]
    b1 = b1_ref[0]                                       # (1, mlp_dim)

    # ---------------- PreNorm + multi-head attention ----------------
    # One fused, lane-dense QKV projection over all batch rows of the block.
    h = _layer_norm(x, ln1_g, ln1_b).astype(bf16)
    qkv = jnp.dot(h.reshape(b_blk * S, D), wqkv_ref[0],
                  preferred_element_type=jnp.float32)    # (b_blk*S, 3*inner)
    qkv = qkv.reshape(b_blk, S, 3 * inner)

    key_mask = jax.lax.broadcasted_iota(jnp.int32, (S, S), 1) < s_valid
    for b in range(b_blk):              # static unroll; b_blk and heads small
        for hd in range(heads):
            q = qkv[b, :, hd * dh:(hd + 1) * dh]         # scale folded in wq
            k = qkv[b, :, inner + hd * dh:inner + (hd + 1) * dh]
            v = qkv[b, :, 2 * inner + hd * dh:2 * inner + (hd + 1) * dh]
            dots = jax.lax.dot_general(                  # q @ k^T, (S, S)
                q.astype(bf16), k.astype(bf16), (((1,), (1,)), ((), ())),
                preferred_element_type=jnp.float32)
            dots = jnp.where(key_mask, dots, -1e30)      # mask padded keys
            dots = dots - jnp.max(dots, axis=-1, keepdims=True)
            e = jnp.exp(dots)
            attn = e * pl.reciprocal(jnp.sum(e, axis=-1, keepdims=True),
                                     approx=True)
            ctx_ref[b, :, hd * dh:(hd + 1) * dh] = jnp.dot(
                attn.astype(bf16), v.astype(bf16),
                preferred_element_type=jnp.float32).astype(bf16)

    # One lane-dense output projection from the packed per-head contexts.
    proj = jnp.dot(ctx_ref[...].reshape(b_blk * S, inner), wo_ref[0],
                   preferred_element_type=jnp.float32)   # (b_blk*S, D)
    x = x + proj.reshape(b_blk, S, D) + bo

    # ---------------- PreNorm + MLP (exact GELU) ----------------
    h2 = _layer_norm(x, ln2_g, ln2_b).astype(bf16).reshape(b_blk * S, D)
    hid = jnp.dot(h2, w1_ref[0], preferred_element_type=jnp.float32) + b1
    hid = jax.nn.gelu(hid, approximate=False)            # == torch nn.GELU()
    mlp = jnp.dot(hid.astype(bf16), w2_ref[0],
                  preferred_element_type=jnp.float32)
    o_ref[...] = x + mlp.reshape(b_blk, S, D) + b2


def head_kernel(x_ref, g_ref, b_ref, w_ref, bias_ref, o_ref, *, pool, n_valid):
    # x_ref: (hb, S_pad, D) f32 ; w_ref: (D, C_pad) bf16 ; o_ref: (hb, C_pad)
    x = x_ref[...]
    if pool == "cls":
        pooled = x[:, 0, :]
    else:  # mean pooling over valid rows via a sublane mask (tile-aligned)
        S = x.shape[1]
        mask = jax.lax.broadcasted_iota(jnp.int32, (1, S, 1), 1) < n_valid
        pooled = jnp.sum(jnp.where(mask, x, 0.0), axis=1) * (1.0 / n_valid)
    h = _layer_norm(pooled, g_ref[...], b_ref[...])
    o_ref[...] = (
        jnp.dot(h.astype(jnp.bfloat16), w_ref[...],
                preferred_element_type=jnp.float32)
        + bias_ref[...]
    )


# ----------------------------------------------------------------------------
# Glue: patchify + parameter packing (padding / stacking / bf16 casts)
# ----------------------------------------------------------------------------
def patchify(img, patch_size):
    # 'b c (h p1) (w p2) -> b (h w) (p1 p2 c)'
    B, C, H, W = img.shape
    p = patch_size
    h, w = H // p, W // p
    x = img.reshape(B, C, h, p, w, p)
    x = jnp.transpose(x, (0, 2, 4, 3, 5, 1))       # b h w p1 p2 c
    return x.reshape(B, h * w, p * p * C)


def pack_params(params, cfg):
    dim, heads, dh = cfg["dim"], cfg["heads"], cfg["dim_head"]
    depth, n_cls = cfg["depth"], cfg["num_classes"]
    inner = heads * dh
    n = (cfg["image_size"] // cfg["patch_size"]) ** 2
    s_valid = n + 1
    s_pad = _round_up(s_valid, SUBLANE_BF16)        # 16: bf16 sublane packing
    c_pad = _round_up(n_cls, LANE)
    bf16 = jnp.bfloat16

    # Fused additive term for the embedding kernel.
    add = jnp.zeros((1, s_pad, dim), jnp.float32)
    add = add.at[0, 0].set(params["cls_token"][0, 0] + params["pos_emb"][0, 0])
    add = add.at[0, 1:s_valid].set(
        params["patch_b"] + params["pos_emb"][0, 1:s_valid])

    def stack(name):
        return jnp.stack([lp[name] for lp in params["layers"]], axis=0)

    # Fused QKV slab; fold the softmax scale (dh**-0.5) into the wq columns.
    wqkv = stack("wqkv")                                 # (depth, dim, 3*inner)
    wqkv = wqkv.at[:, :, :inner].multiply(dh ** -0.5)

    # Pack small per-layer dim-wide vectors into one (depth, 8, dim) slab.
    vecs = jnp.concatenate(
        [stack(nm) for nm in ("ln1_g", "ln1_b", "bo", "ln2_g", "ln2_b", "b2")],
        axis=1)                                          # (depth, 6, dim)
    vecs = jnp.pad(vecs, ((0, 0), (0, 8 - vecs.shape[1]), (0, 0)))

    head_w = jnp.pad(params["head_w"], ((0, 0), (0, c_pad - n_cls))).astype(bf16)
    head_bias = jnp.pad(params["head_bias"], ((0, 0), (0, c_pad - n_cls)))

    return dict(
        patch_w=params["patch_w"].astype(bf16),
        embed_add=add,
        vecs=vecs,
        b1=stack("b1"),                                  # (depth, 1, mlp_dim)
        wqkv=wqkv.astype(bf16),                          # (depth, dim, 3*inner)
        wo=stack("wo").astype(bf16),                     # (depth, inner, dim)
        w1=stack("w1").astype(bf16),
        w2=stack("w2").astype(bf16),
        head_g=params["head_g"], head_b=params["head_b"],
        head_w=head_w, head_bias=head_bias,
    )


# ----------------------------------------------------------------------------
# Full forward (pallas)
# ----------------------------------------------------------------------------
def vit_forward(img, packed, cfg):
    B = img.shape[0]
    p = cfg["patch_size"]
    dim, depth = cfg["dim"], cfg["depth"]
    heads, dh, mlp_dim = cfg["heads"], cfg["dim_head"], cfg["mlp_dim"]
    inner = heads * dh
    n = (img.shape[2] // p) * (img.shape[3] // p)
    s_valid = n + 1
    s_pad = packed["embed_add"].shape[1]
    c_pad = packed["head_w"].shape[-1]

    # image -> zero-padded patch rows (row 0 reserved for the cls token)
    patches = patchify(img, p).astype(jnp.bfloat16)            # (B, n, P)
    P = patches.shape[-1]
    patches = jnp.pad(patches, ((0, 0), (1, s_pad - s_valid), (0, 0)))

    # ---- fused patch-embed + cls token + pos-emb ----
    x = pl.pallas_call(
        embed_kernel,
        out_shape=jax.ShapeDtypeStruct((B, s_pad, dim), jnp.float32),
        grid=(B,),
        in_specs=[
            pl.BlockSpec((1, s_pad, P), lambda b: (b, 0, 0)),
            pl.BlockSpec((P, dim), lambda b: (0, 0)),
            pl.BlockSpec((1, s_pad, dim), lambda b: (0, 0, 0)),
        ],
        out_specs=pl.BlockSpec((1, s_pad, dim), lambda b: (b, 0, 0)),
        compiler_params=pltpu.CompilerParams(dimension_semantics=("parallel",)),
    )(patches, packed["patch_w"], packed["embed_add"])

    # ---- all transformer layers in one pallas_call, batch-blocked ----
    b_blk = _pick_batch_blk(B)
    kern = functools.partial(transformer_layers_kernel,
                             heads=heads, dh=dh, s_valid=s_valid)

    # VMEM budget: double-buffered bf16 weights + residual blocks + activations.
    layer_w_bytes = 2 * (dim * 3 * inner + inner * dim + 2 * dim * mlp_dim)
    act_bytes = b_blk * s_pad * (dim * 4 * 4 + 3 * inner * 4 + mlp_dim * 4
                                 + inner * 2)
    vmem_est = 2 * layer_w_bytes + act_bytes + (8 << 20)

    x = pl.pallas_call(
        kern,
        out_shape=jax.ShapeDtypeStruct((B, s_pad, dim), jnp.float32),
        grid=(B // b_blk, depth),
        in_specs=[
            pl.BlockSpec((b_blk, s_pad, dim), lambda b, d: (b, 0, 0)),   # x (d==0)
            pl.BlockSpec((1, 8, dim), lambda b, d: (d, 0, 0)),           # vec slab
            pl.BlockSpec((1, 1, mlp_dim), lambda b, d: (d, 0, 0)),       # b1
            pl.BlockSpec((1, dim, 3 * inner), lambda b, d: (d, 0, 0)),   # wqkv
            pl.BlockSpec((1, inner, dim), lambda b, d: (d, 0, 0)),       # wo
            pl.BlockSpec((1, dim, mlp_dim), lambda b, d: (d, 0, 0)),     # w1
            pl.BlockSpec((1, mlp_dim, dim), lambda b, d: (d, 0, 0)),     # w2
        ],
        out_specs=pl.BlockSpec((b_blk, s_pad, dim), lambda b, d: (b, 0, 0)),
        scratch_shapes=[pltpu.VMEM((b_blk, s_pad, inner), jnp.bfloat16)],
        compiler_params=pltpu.CompilerParams(
            dimension_semantics=("parallel", "arbitrary"),
            vmem_limit_bytes=_vmem_limit_bytes(vmem_est),
        ),
    )(x, packed["vecs"], packed["b1"], packed["wqkv"], packed["wo"],
      packed["w1"], packed["w2"])

    # ---- fused pool + LayerNorm + classifier head (batch-tiled) ----
    hb = _pick_head_blk(B, s_pad, dim)
    hk = functools.partial(head_kernel, pool=cfg["pool"], n_valid=s_valid)
    logits = pl.pallas_call(
        hk,
        out_shape=jax.ShapeDtypeStruct((B, c_pad), jnp.float32),
        grid=(B // hb,),
        in_specs=[
            pl.BlockSpec((hb, s_pad, dim), lambda i: (i, 0, 0)),
            pl.BlockSpec((1, dim), lambda i: (0, 0)),
            pl.BlockSpec((1, dim), lambda i: (0, 0)),
            pl.BlockSpec((dim, c_pad), lambda i: (0, 0)),
            pl.BlockSpec((1, c_pad), lambda i: (0, 0)),
        ],
        out_specs=pl.BlockSpec((hb, c_pad), lambda i: (i, 0)),
        compiler_params=pltpu.CompilerParams(dimension_semantics=("parallel",)),
    )(x, packed["head_g"], packed["head_b"], packed["head_w"],
      packed["head_bias"])
    return logits[:, :cfg["num_classes"]]


# ----------------------------------------------------------------------------
# Pure-JAX reference (mirrors the bf16 matmul casts; f32 LN/softmax/GELU)
# ----------------------------------------------------------------------------
def vit_reference(img, params, cfg):
    heads, dh = cfg["heads"], cfg["dim_head"]
    scale = dh ** -0.5
    B = img.shape[0]
    bf16 = jnp.bfloat16

    def mm(a, b):
        return jnp.dot(a.astype(bf16), b.astype(bf16),
                       preferred_element_type=jnp.float32)

    x = mm(patchify(img, cfg["patch_size"]), params["patch_w"]) + params["patch_b"]
    n = x.shape[1]
    cls = jnp.broadcast_to(params["cls_token"], (B, 1, x.shape[-1]))
    x = jnp.concatenate([cls, x], axis=1) + params["pos_emb"][:, : n + 1]

    for lp in params["layers"]:
        h = _layer_norm(x, lp["ln1_g"], lp["ln1_b"])
        qkv = jnp.einsum("bnd,df->bnf", h.astype(bf16), lp["wqkv"].astype(bf16),
                         preferred_element_type=jnp.float32)
        q, k, v = jnp.split(qkv, 3, axis=-1)

        def split_heads(t):
            return t.reshape(B, -1, heads, dh).transpose(0, 2, 1, 3)

        q, k, v = split_heads(q), split_heads(k), split_heads(v)
        dots = jnp.einsum("bhnd,bhmd->bhnm", q.astype(bf16), k.astype(bf16),
                          preferred_element_type=jnp.float32) * scale
        attn = jax.nn.softmax(dots, axis=-1)
        out = jnp.einsum("bhnm,bhmd->bhnd", attn.astype(bf16), v.astype(bf16),
                         preferred_element_type=jnp.float32)
        out = out.transpose(0, 2, 1, 3).reshape(B, -1, heads * dh)
        x = x + mm(out, lp["wo"]) + lp["bo"]

        h2 = _layer_norm(x, lp["ln2_g"], lp["ln2_b"])
        hid = jax.nn.gelu(mm(h2, lp["w1"]) + lp["b1"], approximate=False)
        x = x + mm(hid, lp["w2"]) + lp["b2"]

    x = x[:, 0] if cfg["pool"] == "cls" else jnp.mean(x, axis=1)
    h = _layer_norm(x, params["head_g"], params["head_b"])
    return mm(h, params["head_w"]) + params["head_bias"]


# ----------------------------------------------------------------------------
# Deterministic synthetic parameters (shapes match the PyTorch module)
# ----------------------------------------------------------------------------
def init_params(key, *, channels, patch_size, dim, depth, heads, dim_head,
                mlp_dim, num_classes, num_patches):
    inner = heads * dim_head
    patch_dim = channels * patch_size * patch_size
    keys = iter(jax.random.split(key, 128))

    def normal(shape, std=0.2):
        return std * jax.random.normal(next(keys), shape, jnp.float32)

    params = {
        "patch_w": normal((patch_dim, dim)),
        "patch_b": normal((1, dim), std=0.05),
        "cls_token": normal((1, 1, dim), std=1.0),           # torch.randn
        "pos_emb": normal((1, num_patches + 1, dim), std=1.0),
        "layers": [],
        "head_g": 1.0 + normal((1, dim), std=0.05),
        "head_b": normal((1, dim), std=0.05),
        "head_w": normal((dim, num_classes)),
        "head_bias": normal((1, num_classes), std=0.05),
    }
    for _ in range(depth):
        params["layers"].append({
            "ln1_g": 1.0 + normal((1, dim), std=0.05),
            "ln1_b": normal((1, dim), std=0.05),
            "wqkv": normal((dim, 3 * inner)),                 # to_qkv (bias=False)
            "wo": normal((inner, dim)),
            "bo": normal((1, dim), std=0.05),
            "ln2_g": 1.0 + normal((1, dim), std=0.05),
            "ln2_b": normal((1, dim), std=0.05),
            "w1": normal((dim, mlp_dim)),
            "b1": normal((1, mlp_dim), std=0.05),
            "w2": normal((mlp_dim, dim)),
            "b2": normal((1, dim), std=0.05),
        })
    return params


# ----------------------------------------------------------------------------
if __name__ == "__main__":
    cfg = dict(
        image_size=16, patch_size=4, num_classes=10, dim=32, depth=2,
        heads=4, dim_head=8, mlp_dim=64, channels=3, pool="cls",
    )
    num_patches = (cfg["image_size"] // cfg["patch_size"]) ** 2

    key = jax.random.PRNGKey(0)
    pkey, ikey = jax.random.split(key)
    params = init_params(
        pkey,
        channels=cfg["channels"], patch_size=cfg["patch_size"], dim=cfg["dim"],
        depth=cfg["depth"], heads=cfg["heads"], dim_head=cfg["dim_head"],
        mlp_dim=cfg["mlp_dim"], num_classes=cfg["num_classes"],
        num_patches=num_patches,
    )
    # NCHW image, as in the PyTorch module.
    img = jax.random.normal(
        ikey, (2, cfg["channels"], cfg["image_size"], cfg["image_size"]),
        jnp.float32,
    )

    packed = pack_params(params, cfg)
    out = vit_forward(img, packed, cfg)
    out = jax.block_until_ready(out)
    assert out.shape == (2, cfg["num_classes"])

    ref = vit_reference(img, params, cfg)
    np.testing.assert_allclose(np.asarray(out), np.asarray(ref),
                               rtol=2e-2, atol=2e-2)

    print("KERNEL_OK")
</pallas_src>

<mosaic_0001>
module attributes {stable_mosaic.version = 11 : i64} {
  func.func @embed_kernel(%arg0: i32, %arg1: memref<1x32x48xbf16, #tpu.memory_space<vmem>>, %arg2: memref<48x32xbf16, #tpu.memory_space<vmem>>, %arg3: memref<1x32x32xf32, #tpu.memory_space<vmem>>, %arg4: memref<1x32x32xf32, #tpu.memory_space<vmem>>) attributes {dimension_semantics = [#tpu.dimension_semantics<parallel>], iteration_bounds = array<i64: 2>, scalar_prefetch = 0 : i64, scratch_operands = 0 : i64, tpu.core_type = #tpu.core_type<tc>, window_params = [{transform_indices = @transform_0, window_bounds = array<i64: 1, 32, 48>}, {pipeline_mode = #tpu.pipeline_mode<synchronous>, transform_indices = @transform_1, window_bounds = array<i64: 48, 32>}, {pipeline_mode = #tpu.pipeline_mode<synchronous>, transform_indices = @transform_2, window_bounds = array<i64: 1, 32, 32>}, {transform_indices = @transform_3, window_bounds = array<i64: 1, 32, 32>}]} {
    %c0 = arith.constant 0 : index
    %c0_0 = arith.constant 0 : index
    %c0_1 = arith.constant 0 : index
    %0 = vector.load %arg1[%c0, %c0_0, %c0_1] : memref<1x32x48xbf16, #tpu.memory_space<vmem>>, vector<1x32x48xbf16>
    %1 = vector.shape_cast %0 : vector<1x32x48xbf16> to vector<32x48xbf16>
    %c0_2 = arith.constant 0 : index
    %c0_3 = arith.constant 0 : index
    %2 = vector.load %arg2[%c0_2, %c0_3] : memref<48x32xbf16, #tpu.memory_space<vmem>>, vector<48x32xbf16>
    %cst = arith.constant dense<0.000000e+00> : vector<32x32xf32>
    %3 = tpu.matmul %1, %2, %cst {dimension_numbers = #tpu.dot_dimension_numbers<[1], [0], [0], [1], [0, 0, 1, 1], [], []>} : vector<32x48xbf16>, vector<48x32xbf16>, vector<32x32xf32> -> vector<32x32xf32>
    %c0_4 = arith.constant 0 : index
    %c0_5 = arith.constant 0 : index
    %c0_6 = arith.constant 0 : index
    %4 = vector.load %arg3[%c0_4, %c0_5, %c0_6] : memref<1x32x32xf32, #tpu.memory_space<vmem>>, vector<1x32x32xf32>
    %5 = vector.shape_cast %4 : vector<1x32x32xf32> to vector<32x32xf32>
    %6 = arith.addf %3, %5 : vector<32x32xf32>
    %c0_7 = arith.constant 0 : index
    %c0_8 = arith.constant 0 : index
    %c0_9 = arith.constant 0 : index
    %7 = vector.load %arg4[%c0_7, %c0_8, %c0_9] : memref<1x32x32xf32, #tpu.memory_space<vmem>>, vector<1x32x32xf32>
    %8 = vector.shape_cast %7 : vector<1x32x32xf32> to vector<32x32xf32>
    %9 = vector.shape_cast %6 : vector<32x32xf32> to vector<1x32x32xf32>
    tpu.vector_store %arg4[%c0_7, %c0_8, %c0_9], %9 {strides = array<i32>} : memref<1x32x32xf32, #tpu.memory_space<vmem>>, vector<1x32x32xf32>,
    return
  }
  func.func @transform_0(%arg0: i32) -> (i32, i32, i32) {
    %c0_i32 = arith.constant 0 : i32
    %c0_i32_0 = arith.constant 0 : i32
    %c0_i32_1 = arith.constant 0 : i32
    return %arg0, %c0_i32, %c0_i32_0 : i32, i32, i32
  }
  func.func @transform_1(%arg0: i32) -> (i32, i32) {
    %c0_i32 = arith.constant 0 : i32
    %c0_i32_0 = arith.constant 0 : i32
    %c0_i32_1 = arith.constant 0 : i32
    return %c0_i32, %c0_i32_0 : i32, i32
  }
  func.func @transform_2(%arg0: i32) -> (i32, i32, i32) {
    %c0_i32 = arith.constant 0 : i32
    %c0_i32_0 = arith.constant 0 : i32
    %c0_i32_1 = arith.constant 0 : i32
    %c0_i32_2 = arith.constant 0 : i32
    return %c0_i32, %c0_i32_0, %c0_i32_1 : i32, i32, i32
  }
  func.func @transform_3(%arg0: i32) -> (i32, i32, i32) {
    %c0_i32 = arith.constant 0 : i32
    %c0_i32_0 = arith.constant 0 : i32
    %c0_i32_1 = arith.constant 0 : i32
    return %arg0, %c0_i32, %c0_i32_0 : i32, i32, i32
  }
}

</mosaic_0001>

<bundles_post_ra>
// kernel: tpu_custom_call.1
= control target key start
LH: loop header
LB: loop body
LE: loop exit
PB: predicated region body
PF: predicated region fallthrough
CT: control target
= control target key end

     0   :  { %8 = vsyncpa [#allocation3], 0  ;;  %s681_s0 = inlined_call_operand.vmem [shape: bf16[2,32,48], index: 0, kind: input, shape index: {}]   ;;  %s682_s1 = inlined_call_operand.vmem [shape: bf16[48,32], index: 1, kind: input, shape index: {}]   ;;  %s683_s2 = inlined_call_operand.hbm [shape: f32[1,32,32], index: 2, kind: input, shape index: {}]   ;;  %s684_s3 = inlined_call_operand.hbm [shape: f32[2,32,32], index: 3, kind: output, shape index: {}]  }
   0x1   :  { %9 = vsyncpa [#allocation4], 0 }
   0x2   :  { %11 = vsyncpa [#allocation4 + $0x1], 0  ;;  %s573_s12 = smov 0   ;;  %s575_s13 = smov 0  }
   0x3   :  { %s577_s14 = smov 0   ;;  %s579_s15 = smov 0  }
   0x4 LB: > { %s594_s16 = sadd.s32 4294967295, %s546_s15   ;;  %s350_s17 = sadd.s32 4294967294, %s546_s15   ;;  %s546_s15 = sphi %s579_s15, %s690_s15   ;;  %s542_s14 = sphi %s577_s14, %s689_s14   ;;  %s538_s13 = sphi %s575_s13, %s688_s13   ;;  %s534_s12 = sphi %s573_s12, %s687_s12  }
   0x5   : > { %s598_s18 = sadd.s32 1, %s546_s15   ;;  %s92_s19 = sadd.s32 1, %s542_s14 }
   0x6   : > { %s89_s20 = ssub.s32 %s546_s15, %s598_s18  ;;  %p102_p0 = scmp.ne.s32.totalorder %s542_s14, %s538_s13 }
   0x7   : > { %p90_p1 = scmp.eq.s32.totalorder %s89_s20, 0  ;;  %p103_p2 = scmp.eq.s32.totalorder %s594_s16, 1 }
   0x8   : > { %p108_p3 = scmp.ne.s32.totalorder %s538_s13, %s534_s12  ;;  %p109_p4 = scmp.eq.s32.totalorder %s350_s17, 1 }
   0x9   : > { %s609_s21 = scalar_select %p90_p1, %s542_s14, %s92_s19  }
   0xa   : > { %p611_p5 = por %p103_p2, %p102_p0  ;;  %p615_p6 = por %p109_p4, %p108_p3 }
   0xb   : > { %p351_p7 = scmp.ge.s32.totalorder %s546_s15, 1  ;;  %p116_p8 = scmp.lt.s32.totalorder %s546_s15, 3 }
   0xc   : > { %p410_p9 = scmp.eq.s32.totalorder %s594_s16, 0  ;;  %s130_s26 = sshll.u32 %s683_s2, 4  ;;  %s131_s26 = int_to_ptr.hbm [resolvable:$true] %s130_s26 }
   0xd   : > { %p117_p10 = pnand %p351_p7, %p116_p8  ;;  %s548_s27 = smov [#allocation2]  }
   0xe   : > { %s132_s28 = sshll.u32 %s548_s27, 4  ;;  %s549_s29 = smov 128   ;;  %s133_s28 = int_to_ptr.vmem [resolvable:$true] %s132_s28 }
   0xf   : > { %p402_p11 = pneg %p117_p10  ;;  %s550_s30 = smov 8  }
  0x10   : > { %156 = sbr.rel (%p117_p10) target bundleno = 175 (0xaf), region = 32 }
  0x11   : > { %p403_p12 = pnand %p410_p9, %p402_p11 }
  0x13   : > { %405 = dma.hbm_to_vmem [thread:$0]  (!%p403_p12), %s131_s26, 512, %s133_s28, [#allocation3], %s549_s29, %s549_s29, %s550_s30  }
  0x15   : > { %525 = dma.done.wait (%p410_p9), [#allocation3], 512  }
  0x16   : > { %527 = vsyncadd (%p410_p9), [#allocation3], 4294966784  ;;  %p181_p13 = scmp.lt.s32.totalorder %s594_s16, 1  ;;  %v391_v0 = vld [vmem:[%s682_s1 + $0x10] sm:$0xff]  ;;  %v390_v1 = vld [vmem:[%s682_s1 + $0x8] sm:$0xff]  ;;  %vm229_vm0 = vcmask 392192  }
  0x17   : > { %241 = vmatpush.bf16.msra.mxu0 %v391_v0  ;;  %393 = vmatpush.bf16.msra.mxu1 %v391_v0  ;;  %v389_v2 = vld [vmem:[%s682_s1] sm:$0xff]  ;;  %s178_s24 = sand.u32 1, %s538_s13   ;;  %v199_v6 = vld [vmem:[#allocation2 + $0x10] sm:$0xff]  ;;  %vm255_vm1 = vcmask 261120   ;;  %s392_s26 = sshll.u32 %s594_s16, 5  ;;  %v198_v11 = vld [vmem:[#allocation2 + $0x8] sm:$0xff] }
  0x18   : > { %s182_s4 = scalar_select %p181_p13, %s594_s16, 1  ;;  %v197_v5 = vld [vmem:[#allocation2] sm:$0xff]  ;;  %v200_v12 = vld [vmem:[#allocation2 + $0x18] sm:$0xff] }
  0x19   : > { %s356_s25 = sshll.u32 %s178_s24, 5  ;;  %s272_s30 = scalar_lea.hbm %s684_s3, %s392_s26 }
  0x1a   : > { %s386_s9 = sshll.u32 %s182_s4, 4  ;;  %s180_s27 = scalar_lea.vmem [#allocation5], %s356_s25 }
  0x1b   : > { %242 = vmatpush.bf16.msra.mxu0 %v390_v1  ;;  %394 = vmatpush.bf16.msra.mxu1 %v390_v1  ;;  %s185_s20 = scalar_lea.vmem %s681_s0, %s386_s9  ;;  %s273_s4 = sshll.u32 %s180_s27, 4  ;;  %s274_s4 = int_to_ptr.vmem [resolvable:$true] %s273_s4 }
  0x1c   : > { %v387_v3 = vld [vmem:[%s185_s20] sm:$0xff]  ;;  %v388_v4 = vld [vmem:[%s185_s20 + $0x8] sm:$0xff]  ;;  %s275_s5 = sshll.u32 %s272_s30, 4  ;;  %s261_s16 = scalar_lea.sflag [#allocation4], %s178_s24  ;;  %s276_s5 = int_to_ptr.hbm [resolvable:$true] %s275_s5 }
  0x1d   : > { %s494_s6 = sshra.s32 %s276_s5, 4  ;;  %s500_s10 = scalar_lea.hbm %s684_s3, 64  ;;  %s495_s6 = int_to_ptr.hbm [resolvable:$true] %s494_s6 }
  0x1e   : > { %s496_s7 = scalar_lea.hbm %s495_s6, 32  ;;  %p501_p3 = scmp.lt.s32.totalorder %s495_s6, %s684_s3 }
  0x1f   : > { %243 = vmatpush.bf16.msra.mxu0 %v389_v2  ;;  %395 = vmatpush.bf16.msra.mxu1 %v389_v2  ;;  %p497_p0 = scmp.ne.s32.totalorder %s495_s6, %s496_s7  ;;  %p502_p4 = scmp.lt.s32.totalorder %s500_s10, %s496_s7 }
  0x21   : > { %p498_p1 = pnand %p497_p0, %p611_p5  ;;  %p503_p7 = por %p502_p4, %p501_p3 }
  0x22   : > { %379 = vmatmul.msk.bf16.vlgmr.msra.gmra.mxu0 %vm229_vm0, %v387_v3  ;;  %380 = vmatmul.msk.bf16.vlgmr.msra.gmra.mxu1 %vm229_vm0, %v388_v4 }
  0x23   : > { %p499_p2 = pneg %p498_p1 }
  0x25   : > { %p504_p8 = pnand %p503_p7, %p499_p2 }
  0x9f   : > { %v245_v7 = vpop.f32.mrf.mxu0  ;;  %v250_v8 = vpop.f32.mrf.mxu1 }
  0xa0   : > { %v246_v9 = vadd.f32 %v245_v7, %v197_v5  ;;  %v251_v10 = vadd.f32 %v250_v8, %v199_v6 }
  0xa2   : > { %256 = vst.msk [vmem:[%s180_s27] sm:$0xff] %vm255_vm1, %v246_v9 }
  0xa3   : > { %258 = vst.msk [vmem:[%s180_s27 + $0x10] sm:$0xff] %vm255_vm1, %v251_v10 }
  0xa7   : > { %v247_v13 = vpop.f32.mrf.mxu0  ;;  %v252_v14 = vpop.f32.mrf.mxu1 }
  0xa8   : > { %v248_v15 = vadd.f32 %v247_v13, %v198_v11  ;;  %v253_v16 = vadd.f32 %v252_v14, %v200_v12 }
  0xaa   : > { %257 = vst.msk [vmem:[%s180_s27 + $0x8] sm:$0xff] %vm255_vm1, %v248_v15 }
  0xab   : > { %259 = vst.msk [vmem:[%s180_s27 + $0x18] sm:$0xff] %vm255_vm1, %v253_v16 }
  0xac   : > { %507 = shalt.err (!%p504_p8)
}
  0xad   : > { %s551_s19 = smov 128   ;;  %s552_s20 = smov 8  }
  0xae   : > { %400 = dma.vmem_to_hbm [thread:$0]  (%p611_p5), %s274_s4, 512, %s276_s5, %s261_s16, %s551_s19, %s551_s19, %s552_s20  }
  0xaf PF: > { %p412_p9 = scmp.ge.s32.totalorder %s546_s15, 2  ;;  %s290_s24 = sand.u32 1, %s534_s12  }
  0xb0   : > { %s291_s25 = scalar_lea.sflag [#allocation4], %s290_s24 }
  0xb1   : > { %p407_p10 = pnand %p412_p9, %p615_p6 }
  0xb3   : > { %p408_p11 = pneg %p407_p10 }
  0xb5   : > { %529 = dma.done.wait (%p408_p11), %s291_s25, 512  }
  0xb6   : > { %531 = vsyncadd (%p408_p11), %s291_s25, 4294966784  ;;  %p14_p12 = scmp.ge.s32.totalorder %s598_s18, 4   ;;  %s687_s12 = smov %s538_s13 }
  0xb7   : > { %s688_s13 = smov %s542_s14  ;;  %s689_s14 = smov %s609_s21 }
  0xb8   : > { %s690_s15 = smov %s598_s18  ;;  %16 = sbr.rel (!%p14_p12) target bundleno = 4 (0x4), region = 72 }
  0xbd   :  { %297 = vsyncpa [#allocation3], 1 }
  0xbe   :  { %299 = vsyncpa [#allocation3 + $0x1], 1 }
  0xbf   :  { %300 = vsyncpa [#allocation4], 1 }
  0xc0   :  { %302 = vsyncpa [#allocation4 + $0x1], 1 }

</bundles_post_ra>
